<compile_context>
chip_gen: v7x
topology: tpu7x:2x2x1
jax: 0.10.0
libtpu: 0.0.40
codegen_flags: <defaults>
</compile_context>

<pallas_src>
import jax
import jax.numpy as jnp
from jax import lax
from jax.experimental import pallas as pl
from jax.experimental.pallas import tpu as pltpu


def _round_up(n, m):
    return ((n + m - 1) // m) * m


def _make_value_function_kernel(n_sub: int, sub: int):
    """Kernel over one (TB = n_sub*sub, d_in) x tile -> (1, n_sub, sub) output block."""

    def kernel(x_ref, w1_ref, b1_ref, w2_ref, b2_ref, o_ref):
        # Weights are whole-array VMEM residents; load once per grid step.
        w1 = w1_ref[...]          # (d_in, 64)
        b1 = b1_ref[...]          # (1, 64)
        w2 = w2_ref[...]          # (1, 64)
        b2 = b2_ref[0, 0]         # scalar from SMEM

        def compute(j):
            start = j * sub
            if n_sub > 1:
                start = pl.multiple_of(start, sub)
            xs = x_ref[pl.ds(start, sub), :]                       # (sub, d_in)
            # trunk: Linear(d_in, 64) + ReLU  (MXU matmul, f32 accumulate)
            h = jnp.dot(xs, w1, preferred_element_type=jnp.float32)
            h = jnp.maximum(h + b1, 0.0)                           # (sub, 64)
            # fc1: Linear(64, 1) as a contraction over the shared 64-feature
            # axis -> lane-dense (1, sub) row.
            v = lax.dot_general(
                w2, h,
                dimension_numbers=(((1,), (1,)), ((), ())),
                preferred_element_type=jnp.float32,
            ) + b2                                                 # (1, sub)
            o_ref[0, pl.ds(j, 1), :] = v

        if n_sub == 1:
            compute(0)
        else:
            @pl.loop(0, n_sub)
            def _(j):
                compute(j)

    return kernel


def value_function(x, w1, b1, w2, b2, *, block_rows=8192, sub_rows=1024):
    """x: (B, d_in); w1: (d_in, 64); b1: (1, 64); w2: (1, 64); b2: (1, 1) -> (B, 1) f32.

    `x`/`w1` may be bf16 (accumulation stays f32); pass bf16 from the producer
    rather than casting here.  Sweep block_rows in 4096..16384 for peak HBM
    roofline; sub_rows bounds the live hidden-activation temp.
    """
    B, d_in = x.shape
    hidden = w1.shape[1]

    # Sub-chunk: bounds the live (SUB, hidden) f32 temp (~256 KiB at 1024).
    SUB = max(8, min(_round_up(sub_rows, 8), _round_up(B, 8)))
    # Batch tile: as large as possible (amortize per-grid-step overhead), a
    # multiple of SUB, capped by block_rows, and capped at ceil(B/2) for large B
    # so both v7x TensorCores get work.
    TB = min(_round_up(block_rows, SUB), _round_up(B, SUB))
    if B > 2 * SUB:
        TB = min(TB, _round_up(pl.cdiv(B, 2), SUB))
    n_sub = TB // SUB
    num_tiles = pl.cdiv(B, TB)                 # partial last block; no jnp.pad

    # VMEM budget: double-buffered x tile, lane-padded to 128 columns, plus
    # headroom for weights / output / internal scratch.  Clamped to stay inside
    # v7x's 64 MiB physical VMEM.
    lane_cols = _round_up(d_in, 128)
    x_buf_bytes = 2 * TB * lane_cols * x.dtype.itemsize
    vmem_limit = int(min(max(x_buf_bytes + (8 << 20), 16 << 20), 48 << 20))

    weight_bytes = sum(int(a.size) * a.dtype.itemsize for a in (w1, b1, w2, b2))
    cost = pl.CostEstimate(
        flops=2 * int(B) * (d_in * hidden + hidden),
        transcendentals=0,
        bytes_accessed=int(B) * d_in * x.dtype.itemsize + int(B) * 4 + weight_bytes,
    )

    vmem = pl.BlockSpec(memory_space=pltpu.MemorySpace.VMEM)   # resident weights
    smem = pl.BlockSpec(memory_space=pltpu.MemorySpace.SMEM)   # scalar bias

    out = pl.pallas_call(
        _make_value_function_kernel(n_sub, SUB),
        out_shape=jax.ShapeDtypeStruct((num_tiles, n_sub, SUB), jnp.float32),
        grid=(num_tiles,),
        in_specs=[
            pl.BlockSpec((TB, d_in), lambda i: (i, 0)),        # x: streamed per batch tile
            vmem,                                              # w1
            vmem,                                              # b1
            vmem,                                              # w2 (row form (1, 64))
            smem,                                              # b2 (1, 1) scalar
        ],
        out_specs=pl.BlockSpec((1, n_sub, SUB), lambda i: (i, 0, 0)),
        compiler_params=pltpu.CompilerParams(
            dimension_semantics=("parallel",),                 # megacore-shardable batch axis
            vmem_limit_bytes=vmem_limit,
        ),
        cost_estimate=cost,
    )(x, w1, b1, w2, b2)

    # (num_tiles, n_sub, SUB) row-major == padded batch order; tail-garbage rows
    # (from the partial last x block) are dropped by the [:B] slice.
    return out.reshape(num_tiles * TB, 1)[:B]


def _torch_linear_init(key, fan_in, fan_out):
    """Deterministic init matching nn.Linear's default U(-1/sqrt(fan_in), 1/sqrt(fan_in))."""
    kw, kb = jax.random.split(key)
    bound = 1.0 / jnp.sqrt(jnp.float32(fan_in))
    w = jax.random.uniform(kw, (fan_in, fan_out), jnp.float32, -bound, bound)
    b = jax.random.uniform(kb, (1, fan_out), jnp.float32, -bound, bound)
    return w, b


if __name__ == "__main__":
    # Small demo shapes; B deliberately not a tile multiple so we exercise the
    # multi-step grid, the inner sub-chunk loop, and the partial (un-padded)
    # tail block.
    B, D_IN, HIDDEN = 20, 32, 64

    key = jax.random.PRNGKey(0)
    k_x, k_trunk, k_fc1 = jax.random.split(key, 3)

    x = jax.random.normal(k_x, (B, D_IN), jnp.float32)

    # trunk: Linear(D_IN, 64) (+ ReLU in the kernel)
    w1, b1 = _torch_linear_init(k_trunk, D_IN, HIDDEN)
    # fc1: Linear(64, 1); keep its (1, 64) weight row for the contraction form
    w2_full, b2 = _torch_linear_init(k_fc1, HIDDEN, 1)
    w2 = w2_full.reshape(1, HIDDEN)

    # pure-JAX reference
    ref = jnp.maximum(x @ w1 + b1, 0.0) @ w2_full + b2

    # 1) tiny tiles: grid of 2 steps, 2 sub-chunks per step, partial last block
    out_small = value_function(x, w1, b1, w2, b2, block_rows=16, sub_rows=8)
    out_small = jax.block_until_ready(out_small)
    assert out_small.shape == (B, 1)
    assert jnp.allclose(out_small, ref, atol=1e-4, rtol=1e-5), \
        float(jnp.max(jnp.abs(out_small - ref)))

    # 2) default (production) config: single big tile, single sub-chunk path
    out_def = value_function(x, w1, b1, w2, b2)
    out_def = jax.block_until_ready(out_def)
    assert out_def.shape == (B, 1)
    assert jnp.allclose(out_def, ref, atol=1e-4, rtol=1e-5), \
        float(jnp.max(jnp.abs(out_def - ref)))

    print("KERNEL_OK")
</pallas_src>

<mosaic_0001>
module attributes {stable_mosaic.version = 11 : i64} {
  func.func @kernel(%arg0: i32, %arg1: memref<16x32xf32, #tpu.memory_space<vmem>>, %arg2: memref<32x64xf32, #tpu.memory_space<vmem>>, %arg3: memref<1x64xf32, #tpu.memory_space<vmem>>, %arg4: memref<1x64xf32, #tpu.memory_space<vmem>>, %arg5: memref<1x1xf32, #tpu.memory_space<smem>>, %arg6: memref<1x2x8xf32, #tpu.memory_space<vmem>>) attributes {dimension_semantics = [#tpu.dimension_semantics<parallel>], iteration_bounds = array<i64: 2>, scalar_prefetch = 0 : i64, scratch_operands = 0 : i64, tpu.core_type = #tpu.core_type<tc>, window_params = [{transform_indices = @transform_0, window_bounds = array<i64: 16, 32>}, {pipeline_mode = #tpu.pipeline_mode<synchronous>, transform_indices = @transform_1, window_bounds = array<i64: 32, 64>}, {pipeline_mode = #tpu.pipeline_mode<synchronous>, transform_indices = @transform_2, window_bounds = array<i64: 1, 64>}, {pipeline_mode = #tpu.pipeline_mode<synchronous>, transform_indices = @transform_3, window_bounds = array<i64: 1, 64>}, {transform_indices = @transform_4, window_bounds = array<i64: 1, 1>}, {transform_indices = @transform_5, window_bounds = array<i64: 1, 2, 8>}]} {
    %c0 = arith.constant 0 : index
    %c0_0 = arith.constant 0 : index
    %0 = vector.load %arg2[%c0, %c0_0] : memref<32x64xf32, #tpu.memory_space<vmem>>, vector<32x64xf32>
    %c0_1 = arith.constant 0 : index
    %c0_2 = arith.constant 0 : index
    %1 = vector.load %arg3[%c0_1, %c0_2] : memref<1x64xf32, #tpu.memory_space<vmem>>, vector<1x64xf32>
    %c0_3 = arith.constant 0 : index
    %c0_4 = arith.constant 0 : index
    %2 = vector.load %arg4[%c0_3, %c0_4] : memref<1x64xf32, #tpu.memory_space<vmem>>, vector<1x64xf32>
    %c0_5 = arith.constant 0 : index
    %c0_6 = arith.constant 0 : index
    %3 = memref.load %arg5[%c0_5, %c0_6] : memref<1x1xf32, #tpu.memory_space<smem>>
    %c0_i32 = arith.constant 0 : i32
    %c2_i32 = arith.constant 2 : i32
    %4 = arith.addi %c0_i32, %c2_i32 : i32
    %c1_i32 = arith.constant 1 : i32
    scf.for %arg7 = %c0_i32 to %4 step %c1_i32  : i32 {
      %c1_i32_8 = arith.constant 1 : i32
      %5 = arith.muli %arg7, %c1_i32_8 : i32
      %c0_i32_9 = arith.constant 0 : i32
      %6 = arith.addi %c0_i32_9, %5 : i32
      %c8_i32 = arith.constant 8 : i32
      %7 = arith.muli %6, %c8_i32 : i32
      %8 = tpu.assume_multiple %7, 8 : i32
      %9 = arith.index_cast %8 : i32 to index
      %c0_10 = arith.constant 0 : index
      %10 = vector.load %arg1[%9, %c0_10] : memref<16x32xf32, #tpu.memory_space<vmem>>, vector<8x32xf32>
      %cst = arith.constant dense<0.000000e+00> : vector<8x64xf32>
      %11 = tpu.matmul %10, %0, %cst {dimension_numbers = #tpu.dot_dimension_numbers<[1], [0], [0], [1], [0, 0, 1, 1], [], []>} : vector<8x32xf32>, vector<32x64xf32>, vector<8x64xf32> -> vector<8x64xf32>
      %12 = vector.broadcast %1 : vector<1x64xf32> to vector<8x64xf32>
      %13 = arith.addf %11, %12 : vector<8x64xf32>
      %cst_11 = arith.constant 0.000000e+00 : f32
      %14 = vector.broadcast %cst_11 : f32 to vector<8x64xf32>
      %15 = arith.maximumf %13, %14 : vector<8x64xf32>
      %cst_12 = arith.constant dense<0.000000e+00> : vector<1x8xf32>
      %16 = tpu.matmul %2, %15, %cst_12 {dimension_numbers = #tpu.dot_dimension_numbers<[1], [1], [0], [0], [0, 0, 1, 0], [], []>} : vector<1x64xf32>, vector<8x64xf32>, vector<1x8xf32> -> vector<1x8xf32>
      %17 = vector.broadcast %3 : f32 to vector<1x8xf32>
      %18 = arith.addf %16, %17 : vector<1x8xf32>
      %c0_13 = arith.constant 0 : index
      %19 = arith.index_cast %6 : i32 to index
      %c0_14 = arith.constant 0 : index
      %20 = vector.load %arg6[%c0_13, %19, %c0_14] : memref<1x2x8xf32, #tpu.memory_space<vmem>>, vector<1x1x8xf32>
      %21 = vector.shape_cast %20 : vector<1x1x8xf32> to vector<1x8xf32>
      %22 = vector.shape_cast %18 : vector<1x8xf32> to vector<1x1x8xf32>
      tpu.vector_store %arg6[%c0_13, %19, %c0_14], %22 {strides = array<i32>} : memref<1x2x8xf32, #tpu.memory_space<vmem>>, vector<1x1x8xf32>,
    }
    %c2_i32_7 = arith.constant 2 : i32
    return
  }
  func.func @transform_0(%arg0: i32) -> (i32, i32) {
    %c0_i32 = arith.constant 0 : i32
    %c0_i32_0 = arith.constant 0 : i32
    return %arg0, %c0_i32 : i32, i32
  }
  func.func @transform_1(%arg0: i32) -> (i32, i32) {
    %c0_i32 = arith.constant 0 : i32
    %c0_i32_0 = arith.constant 0 : i32
    %c0_i32_1 = arith.constant 0 : i32
    return %c0_i32, %c0_i32_0 : i32, i32
  }
  func.func @transform_2(%arg0: i32) -> (i32, i32) {
    %c0_i32 = arith.constant 0 : i32
    %c0_i32_0 = arith.constant 0 : i32
    %c0_i32_1 = arith.constant 0 : i32
    return %c0_i32, %c0_i32_0 : i32, i32
  }
  func.func @transform_3(%arg0: i32) -> (i32, i32) {
    %c0_i32 = arith.constant 0 : i32
    %c0_i32_0 = arith.constant 0 : i32
    %c0_i32_1 = arith.constant 0 : i32
    return %c0_i32, %c0_i32_0 : i32, i32
  }
  func.func @transform_4(%arg0: i32) -> (i32, i32) {
    %c0_i32 = arith.constant 0 : i32
    %c0_i32_0 = arith.constant 0 : i32
    %c0_i32_1 = arith.constant 0 : i32
    return %c0_i32, %c0_i32_0 : i32, i32
  }
  func.func @transform_5(%arg0: i32) -> (i32, i32, i32) {
    %c0_i32 = arith.constant 0 : i32
    %c0_i32_0 = arith.constant 0 : i32
    %c0_i32_1 = arith.constant 0 : i32
    return %arg0, %c0_i32, %c0_i32_0 : i32, i32, i32
  }
}

</mosaic_0001>

<bundles_post_ra>
// kernel: tpu_custom_call.1
= control target key start
LH: loop header
LB: loop body
LE: loop exit
PB: predicated region body
PF: predicated region fallthrough
CT: control target
= control target key end

     0   :  { %s1068_s0 = inlined_call_operand.hbm [shape: f32[20,32], index: 0, kind: input, shape index: {}]   ;;  %s1069_s1 = inlined_call_operand.hbm [shape: f32[32,64], index: 1, kind: input, shape index: {}]   ;;  %s1070_s2 = inlined_call_operand.vmem [shape: f32[1,64], index: 2, kind: input, shape index: {}]   ;;  %s1071_s3 = inlined_call_operand.vmem [shape: f32[1,64], index: 3, kind: input, shape index: {}]   ;;  %s1072_s4 = inlined_call_operand.<no memory space> [shape: f32[1,1], index: 4, kind: input, shape index: {}]   ;;  %s1073_s5 = inlined_call_operand.hbm [shape: f32[2,2,8], index: 5, kind: output, shape index: {}]  }
   0x1   :  { %10 = sst [smem:[#allocation2]] %s1072_s4 }
   0x2   :  { %11 = vsyncpa [#allocation4], 0 }
   0x3   :  { %13 = vsyncpa [#allocation4 + $0x1], 0 }
   0x4   :  { %14 = vsyncpa [#allocation7], 0 }
   0x5   :  { %15 = vsyncpa [#allocation5], 0 }
   0x6   :  { %17 = vsyncpa [#allocation5 + $0x1], 0  ;;  %s849_s20 = smov 0   ;;  %s851_s21 = smov 0  }
   0x7   :  { %s853_s22 = smov 0   ;;  %s855_s23 = smov 0  }
   0x8 LB: > { %s870_s4 = sadd.s32 4294967295, %s800_s23   ;;  %s550_s24 = sadd.s32 4294967294, %s800_s23   ;;  %s800_s23 = sphi %s855_s23, %s1094_s23   ;;  %s796_s22 = sphi %s853_s22, %s1093_s22   ;;  %s792_s21 = sphi %s851_s21, %s1092_s21   ;;  %s788_s20 = sphi %s849_s20, %s1091_s20  }
   0x9   : > { %s874_s25 = sadd.s32 1, %s800_s23   ;;  %s30_s26 = sadd.s32 1, %s796_s22 }
   0xa   : > { %s27_s27 = ssub.s32 %s800_s23, %s874_s25  ;;  %p37_p0 = scmp.ne.s32.totalorder %s796_s22, %s792_s21 }
   0xb   : > { %p28_p1 = scmp.eq.s32.totalorder %s27_s27, 0  ;;  %p38_p2 = scmp.eq.s32.totalorder %s800_s23, 0 }
   0xc   : > { %p43_p3 = scmp.ne.s32.totalorder %s792_s21, %s788_s20  ;;  %p1074_p4 = scmp.eq.s32.totalorder %s870_s4, 0 }
   0xd   : > { %s886_s28 = scalar_select %p28_p1, %s796_s22, %s30_s26  }
   0xe   : > { %p888_p5 = por %p38_p2, %p37_p0  ;;  %p894_p6 = por %p1074_p4, %p43_p3 }
   0xf   : > { %p151_p7 = scmp.eq.s32.totalorder %s870_s4, 1  ;;  %p157_p8 = scmp.eq.s32.totalorder %s550_s24, 1 }
  0x10   : > { %s1078_s29 = scalar_select %p888_p5, 1, 0 }
  0x11   : > { %s1079_s30 = scalar_select %p894_p6, 1, 0 }
  0x12   : > { %p551_p9 = scmp.ge.s32.totalorder %s800_s23, 1  ;;  %p164_p10 = scmp.lt.s32.totalorder %s800_s23, 3 }
  0x13   : > { %p901_p11 = por %p151_p7, %p37_p0  ;;  %p905_p12 = por %p157_p8, %p43_p3 }
  0x14   : > { %p909_p13 = pnand %p551_p9, %p164_p10  ;;  %s806_s9 = smov [#allocation6]  }
  0x15   : > { %s1080_s6 = scalar_select %p901_p11, 1, 0 }
  0x16   : > { %s1081_s7 = scalar_select %p905_p12, 1, 0 }
  0x17   : > { %s1082_s8 = scalar_select %p909_p13, 1, 0 }
  0x18   : > { %p611_p1 = pneg %p909_p13  ;;  %s176_s10 = sshll.u32 %s806_s9, 4  ;;  %s177_s10 = int_to_ptr.vmem [resolvable:$true] %s176_s10 }
  0x19   : > { %s670_s14 = scalar_lea.hbm %s1069_s1, 512 }
  0x1a   : > { %p917_p2 = pnand %p611_p1, %p1074_p4  ;;  %p671_p0 = scmp.ne.s32.totalorder %s1069_s1, %s670_s14 }
  0x1b   : > { %p677_p9 = scmp.lt.u32.totalorder %s670_s14, %s1069_s1 }
  0x1c   : > { %p672_p3 = pneg %p917_p2 }
  0x1e   : > { %p673_p7 = pnand %p672_p3, %p671_p0 }
  0x20   : > { %p674_p8 = pneg %p673_p7 }
  0x22   : > { %p679_p10 = pnand %p677_p9, %p674_p8 }
  0x24   : > { %682 = shalt.err (!%p679_p10)
}
  0x25   : > { %s683_s19 = scalar_lea.vmem %s177_s10, 512  ;;  %p691_p11 = scmp.lt.s32.totalorder %s177_s10, %s177_s10 }
  0x26   : > { %p684_p1 = scmp.ne.s32.totalorder %s177_s10, %s683_s19  ;;  %p692_p6 = scmp.lt.s32.totalorder %s683_s19, %s683_s19 }
  0x28   : > { %p686_p4 = pnand %p684_p1, %p672_p3  ;;  %p693_p13 = por %p692_p6, %p691_p11 }
  0x2a   : > { %p687_p12 = pneg %p686_p4 }
  0x2c   : > { %p694_p5 = pnand %p693_p13, %p687_p12 }
  0x2e   : > { %697 = shalt.err (!%p694_p5)
}
  0x2f   : > { %s807_s24 = smov 128   ;;  %s808_s26 = smov 8  }
  0x30   : > { %614 = dma.hbm_to_vmem [thread:$0]  (!%p917_p2), %s1069_s1, 512, %s177_s10, [#allocation7], %s807_s24, %s807_s24, %s808_s26  }
  0x31   : > { %p553_p0 = scmp.ge.s32.totalorder %s800_s23, 2 }
  0x32   : > { %p1084_p4 = scmp.ne.s32.totalorder (!%p553_p0), %s1078_s29, 0 }
  0x33   : > { %195 = sbr.rel (%p553_p0) target bundleno = 93 (0x5d), region = 32 }
  0x3a   : > { %198 = sbr.rel (!%p1084_p4) target bundleno = 93 (0x5d), region = 36  ;;  %s199_s12 = sand.u32 (%p1084_p4), 1, %s796_s22  }
  0x3b   : > { %s555_s13 = sshll.u32 (%p1084_p4), %s800_s23, 1  ;;  %s554_s14 = sshll.u32 (%p1084_p4), %s199_s12, 4 }
  0x3c   : > { %s205_s15 = ssub.s32 (%p1084_p4), 3, %s555_s13  ;;  %s947_s16 = scalar_lea.sflag (%p1084_p4), [#allocation4], %s199_s12 }
  0x3d   : > { %p206_p5 = scmp.lt.s32.totalorder (%p1084_p4), %s205_s15, 2  ;;  %s203_s17 = scalar_lea.vmem (%p1084_p4), [#allocation3], %s554_s14 }
  0x41   : > { %s1096_s15 = smov (!%p206_p5, %s205_s15), 2 }
  0x42   : > { %s944_s11 = sshll.u32 %s1096_s15, 7 }
  0x43   : > { %s210_s10 = ssub.s32 256, %s944_s11 }
  0x44   : > { %211 = vsyncadd %s947_s16, %s210_s10  ;;  %p557_p6 = scmp.ne.s32.totalorder %s944_s11, 0  ;;  %s574_s29 = sshll.u32 %s800_s23, 8 }
  0x45   : > { %s955_s24 = scalar_lea.hbm %s1068_s0, %s574_s29  ;;  %s216_s26 = sshll.u32 %s203_s17, 4  ;;  %s957_s26 = int_to_ptr.vmem [resolvable:$true] %s216_s26 }
  0x46   : > { %s698_s27 = scalar_lea.hbm %s955_s24, %s944_s11  ;;  %s702_s13 = scalar_lea.hbm %s1068_s0, 384 }
  0x47   : > { %p699_p11 = scmp.ne.s32.totalorder %s955_s24, %s698_s27  ;;  %p703_p2 = scmp.lt.u32.totalorder %s955_s24, %s1068_s0 }
  0x48   : > { %p704_p3 = scmp.lt.u32.totalorder %s702_s13, %s698_s27  ;;  %p706_p8 = scmp.lt.u32.totalorder %s698_s27, %s955_s24 }
  0x49   : > { %p700_p12 = pnand %p699_p11, %p557_p6 }
  0x4a   : > { %p705_p7 = por %p704_p3, %p703_p2 }
  0x4b   : > { %p701_p13 = pneg %p700_p12 }
  0x4c   : > { %p707_p9 = por %p706_p8, %p705_p7 }
  0x4e   : > { %p708_p10 = pnand %p707_p9, %p701_p13 }
  0x50   : > { %711 = shalt.err (!%p708_p10)
}
  0x51   : > { %s712_s10 = scalar_lea.vmem %s957_s26, %s944_s11  ;;  %s809_s17 = smov [#allocation3]  }
  0x52   : > { %p713_p1 = scmp.ne.s32.totalorder %s957_s26, %s712_s10  ;;  %s716_s29 = sshll.u32 %s809_s17, 4  ;;  %s717_s29 = int_to_ptr.vmem [resolvable:$false] %s716_s29 }
  0x53   : > { %s718_s18 = scalar_lea.vmem %s717_s29, 512  ;;  %p719_p11 = scmp.lt.s32.totalorder %s957_s26, %s717_s29 }
  0x54   : > { %p714_p4 = pnand %p713_p1, %p557_p6  ;;  %p720_p12 = scmp.lt.s32.totalorder %s718_s18, %s712_s10 }
  0x56   : > { %p715_p5 = pneg %p714_p4  ;;  %p721_p2 = por %p720_p12, %p719_p11 }
  0x58   : > { %p722_p3 = pnand %p721_p2, %p715_p5 }
  0x5a   : > { %725 = shalt.err (!%p722_p3)
}
  0x5b   : > { %s810_s19 = smov 128   ;;  %s811_s27 = smov 8  }
  0x5c   : > { %222 = dma.hbm_to_vmem [thread:$0]  (%p557_p6), %s955_s24, %s944_s11, %s957_s26, %s947_s16, %s810_s19, %s810_s19, %s811_s27  }
  0x5d PF: > { %p1085_p13 = scmp.ne.s32.totalorder %s1082_s8, 0 }
  0x5e   : > { %s987_s9 = sand.u32 (!%p1085_p13), 1, %s792_s21   ;;  %p1086_p7 = scmp.ne.s32.totalorder (!%p1085_p13), %s1079_s30, 0 }
  0x5f   : > { %228 = sbr.rel (%p1085_p13) target bundleno = 565 (0x235), region = 40  ;;  %s562_s12 = sshll.u32 (!%p1085_p13), %s987_s9, 4 }
  0x60   : > { %s231_s13 = scalar_lea.sflag (!%p1085_p13), [#allocation4], %s987_s9  ;;  %s991_s14 = scalar_lea.vmem (!%p1085_p13), [#allocation3], %s562_s12 }
  0x66   : > { %775 = dma.done.wait (%p1086_p7), %s231_s13, 256  }
  0x67   : > { %777 = vsyncadd (%p1086_p7), %s231_s13, 4294967040  ;;  %p1087_p6 = scmp.eq.s32.totalorder %s870_s4, 0 }
  0x69   : > { %779 = dma.done.wait (%p1087_p6), [#allocation7], 512   ;;  %p1088_p8 = pmov %p1087_p6 }
  0x6a   : > { %s564_s8 = sshll.u32 %s987_s9, 1  ;;  %s1002_s11 = sld [smem:[#allocation2]]  ;;  %v270_v0 = vld [vmem:[#allocation6] sm:$0xff]  ;;  %v271_v1 = vld [vmem:[#allocation6 + $0x8] sm:$0xff]  ;;  %v272_v2 = vld [vmem:[#allocation6 + $0x10] sm:$0xff] }
  0x6b   : > { %781 = vsyncadd (%p1088_p8), [#allocation7], 4294966784  ;;  %v273_v3 = vld [vmem:[#allocation6 + $0x18] sm:$0xff]  ;;  %v566_v4 = vld [vmem:[%s1070_s2] ss:$0 sm:$0xff]  ;;  %s1010_s15 = scalar_lea.vmem [#allocation8], %s564_s8 }
  0x6c   : > { %v275_v5 = vld [vmem:[%s1071_s3] sm:$0x1]  ;;  %s1012_s10 = smov 0  }
  0x6d LB: >> { %v599_v6 = vpack.c.bf16 %v271_v1, %v270_v0  ;;  %v812_v7 = vmov 0.0|0.0   ;;  %v602_v8 = vpack.c.bf16 %v273_v3, %v272_v2  ;;  %vm813_vm0 = vmmov 0   ;;  %s565_s17 = sshll.u32 %s804_s10, 3  ;;  %s445_s18 = scalar_lea.vmem %s1010_s15, %s804_s10 [#allocation8]  ;;  %s804_s10 = sphi %s1012_s10, %s282_s10  }
  0x6e   : >> { %598 = vmatprep.subr.bf16.mxu0 %v812_v7  ;;  %v814_v9 = vmov 0.0   ;;  %s284_s29 = scalar_lea.vmem %s991_s14, %s565_s17 [#allocation3]  ;;  %vm292_vm1 = vcmask 261120   ;;  %vm368_vm2 = vcmask 523264   ;;  %vm446_vm3 = vcmask 57344   ;;  %s282_s10 = sadd.s32 1, %s804_s10  }
  0x6f   : >> { %600 = vmatpush3.bf16.msra.mxu0 %v599_v6  ;;  %590 = vmatprep.mubr.msk.f32.mxu0 %vm813_vm0, %v814_v9  ;;  %v285_v10 = vld [vmem:[%s284_s29] sm:$0xff]  ;;  %p279_p9 = scmp.ge.s32.totalorder %s282_s10, 2  }
  0x70   : >> { %601 = vmatprep.subr.bf16.mxu0 %v812_v7  ;;  %593 = vmatprep.subr.mxu1 %v814_v9  ;;  %v367_v15 = vstv %s1002_s11  ;;  %s571_s19 = sshll.u32 (%p279_p9), %s870_s4, 5  ;;  %s462_s8 = sshll.u32 (%p279_p9), %s1010_s15, 4  ;;  %s463_s8 = int_to_ptr.vmem [resolvable:$true] %s462_s8 }
  0x71   : >> { %595 = vmatprep.mubr.msk.f32.mxu1 %vm813_vm0, %v814_v9  ;;  %s1029_s13 = scalar_lea.hbm (%p279_p9), %s1073_s5, %s571_s19  ;;  %s449_s16 = scalar_lea.sflag (%p279_p9), [#allocation5], %s987_s9 }
  0x72   : > { %s726_s24 = scalar_lea.vmem (%p279_p9), %s463_s8, 32  ;;  %p1089_p1 = scmp.ne.s32.totalorder (%p279_p9), %s1080_s6, 0 }
  0x73   : >> { %603 = vmatpush3.bf16.msra.mxu0 %v602_v8  ;;  %p727_p10 = scmp.ne.s32.totalorder (%p279_p9), %s463_s8, %s726_s24  ;;  %s815_s30 = smov (%p279_p9), [#allocation8]  }
  0x74   : > { %s730_s26 = sshll.u32 (%p279_p9), %s815_s30, 4  ;;  %s731_s26 = int_to_ptr.vmem [resolvable:$false] %s730_s26 }
  0x75   : > { %p728_p4 = pnand (%p279_p9), %p727_p10, %p1089_p1  ;;  %s732_s14 = scalar_lea.vmem (%p279_p9), %s731_s26, 64 }
  0x76   : >> { %591 = vmatmul.mubr.msk.f32.vlgmr.msra.gmra.mrb[0].mxu0 %vm292_vm1, %v285_v10  ;;  %p733_p11 = scmp.lt.s32.totalorder (%p279_p9), %s463_s8, %s731_s26  ;;  %p734_p12 = scmp.lt.s32.totalorder (%p279_p9), %s732_s14, %s726_s24 }
  0x77   : > { %p729_p5 = pneg (%p279_p9), %p728_p4 }
  0x78   : > { %p735_p2 = por (%p279_p9), %p734_p12, %p733_p11 }
  0x7a   : > { %p736_p3 = pnand (%p279_p9), %p735_p2, %p729_p5 }
 0x149   : >> { %v362_v11 = vpop.f32.mrb[0].mxu0 }
 0x14a   : >> { %v363_v12 = vadd.f32 %v566_v4, %v362_v11  ;;  %v592_v13 = vpop.f32.mrb[1].mxu0 }
 0x14c   : >> { %v366_v14 = vmax.f32 %v363_v12, 0.0 }
 0x14e   : >> { %594 = vmatpush3.xpose.msk.msra.mxu1 %vm368_vm2, %v366_v14 }
 0x151   : >> { %596 = vmatmul.mubr.msk.f32.vlgmr.msra.gmra.mrb[0].mxu1 %vm368_vm2, %v275_v5 }
 0x221   : > { %281 = sbr.rel (!%p279_p9) target bundleno = 109 (0x6d), region = 98 }
 0x224   : >> { %v441_v16 = vpop.f32.mrb[0].mxu1 }
 0x225   : >> { %v442_v17 = vadd.f32 %v441_v16, %v367_v15  ;;  %v597_v18 = vpop.f32.mrb[1].mxu1 }
 0x227   : >> { %447 = vst.msk [vmem:[%s445_s18] sm:$0x1] %vm446_vm3, %v442_v17 }
 0x228   : > { %739 = shalt.err (!%p736_p3)
}
 0x229   : > { %s740_s4 = scalar_lea.hbm %s1029_s13, 32  ;;  %s744_s15 = scalar_lea.hbm %s1073_s5, 64 }
 0x22a   : > { %p741_p13 = scmp.ne.s32.totalorder %s1029_s13, %s740_s4  ;;  %p745_p8 = scmp.lt.u32.totalorder %s1029_s13, %s1073_s5 }
 0x22b   : > { %p746_p9 = scmp.lt.u32.totalorder %s744_s15, %s740_s4  ;;  %p748_p4 = scmp.lt.u32.totalorder %s740_s4, %s1029_s13 }
 0x22c   : > { %p742_p7 = pnand %p741_p13, %p1089_p1 }
 0x22d   : > { %p747_p10 = por %p746_p9, %p745_p8 }
 0x22e   : > { %p743_p6 = pneg %p742_p7 }
 0x22f   : > { %p749_p5 = por %p748_p4, %p747_p10 }
 0x231   : > { %p750_p11 = pnand %p749_p5, %p743_p6 }
 0x233   : > { %753 = shalt.err (!%p750_p11)
}
 0x234   : > { %609 = dma.vmem_to_hbm [thread:$0]  (%p1089_p1), %s463_s8, 32, %s1029_s13, %s449_s16  }
 0x235 PF: > { %s474_s29 = sand.u32 1, %s788_s20   ;;  %p1090_p12 = scmp.ne.s32.totalorder %s1081_s7, 0 }
 0x236   : > { %s475_s18 = scalar_lea.sflag [#allocation5], %s474_s29 }
 0x237   : > { %p616_p2 = pnand %p553_p0, %p1090_p12 }
 0x239   : > { %783 = dma.done.wait (!%p616_p2), %s475_s18, 32  }
 0x23a   : > { %785 = vsyncadd (!%p616_p2), %s475_s18, 4294967264  ;;  %p20_p3 = scmp.ge.s32.totalorder %s874_s25, 4   ;;  %s1091_s20 = smov %s792_s21 }
 0x23b   : > { %s1092_s21 = smov %s796_s22  ;;  %s1093_s22 = smov %s886_s28 }
 0x23c   : > { %s1094_s23 = smov %s874_s25  ;;  %22 = sbr.rel (!%p20_p3) target bundleno = 8 (0x8), region = 109 }
 0x243   :  { %480 = vsyncpa [#allocation4], 1 }
 0x244   :  { %482 = vsyncpa [#allocation4 + $0x1], 1 }
 0x245   :  { %483 = vsyncpa [#allocation7], 1 }
 0x246   :  { %484 = vsyncpa [#allocation5], 1 }
 0x247   :  { %486 = vsyncpa [#allocation5 + $0x1], 1 }

</bundles_post_ra>
